<compile_context>
chip_gen: v5e
topology: v5e:2x2
jax: 0.10.0
libtpu: 0.0.40
codegen_flags: <defaults>
</compile_context>

<pallas_src>
import functools

import jax
import jax.numpy as jnp
from jax.experimental import pallas as pl
from jax.experimental.pallas import tpu as pltpu

_LANES = 128
_SUBLANES = 8


def _circular_loss_kernel(out_ref, tgt_ref, loss_ref, acc_ref, *,
                          inv_b, n_rows, tile_rows, mask_rows):
    # out_ref, tgt_ref: (tile_rows, 128) VMEM tiles of the flattened inputs.
    # loss_ref: (1, 1) f32 VMEM output (resident across the grid).
    # acc_ref:  (8, 128) f32 VMEM scratch accumulator (vreg-shaped).
    i = pl.program_id(0)

    @pl.when(i == 0)
    def _init():
        acc_ref[...] = jnp.zeros_like(acc_ref)

    # Promote to f32 for the diff/square (safe on v5e, which has no bf16 VALU).
    d = out_ref[...].astype(jnp.float32) - tgt_ref[...].astype(jnp.float32)
    d2 = d * d

    if mask_rows:
        # Static toggle: only emitted when the row count is not a multiple of
        # tile_rows.  The last grid block then extends past the true row count
        # and its out-of-bounds rows hold unspecified data -> zero them.
        row = i * tile_rows + jax.lax.broadcasted_iota(jnp.int32, d2.shape, 0)
        d2 = jnp.where(row < n_rows, d2, 0.0)

    # vreg-granular partial sums: (tile_rows,128) -> (tile_rows//8, 8, 128),
    # reduced over the leading axis with pure VALU adds (no XLU per step).
    acc_ref[...] += jnp.sum(
        d2.reshape(tile_rows // _SUBLANES, _SUBLANES, _LANES), axis=0)

    @pl.when(i == pl.num_programs(0) - 1)
    def _finalize():
        # One cross-lane/sublane reduce + divide by the TRUE batch size B.
        loss_ref[...] = jnp.sum(acc_ref[...], keepdims=True) * inv_b


def circular_loss(outputs, targets, *, max_tile_rows=4096):
    """outputs, targets: (B, 2) arrays ([sin, cos] columns). Returns f32 scalar."""
    assert outputs.shape == targets.shape
    assert outputs.ndim == 2 and outputs.shape[1] == 2
    B = outputs.shape[0]
    n = 2 * B

    # Lane-dense layout: view the (B, 2) data as (n_rows, 128).
    n_rows = max(_SUBLANES, pl.cdiv(n, _LANES))   # at least one (8,128) tile
    total = n_rows * _LANES

    if total == n:
        # Free contiguous reshape — zero extra HBM traffic (B % 64 == 0 case).
        out2d = outputs.reshape(n_rows, _LANES)
        tgt2d = targets.reshape(n_rows, _LANES)
    else:
        # Ragged lane tail (or tiny input): pad with < 1024 zeros.  Identical
        # zero-pad on both inputs contributes exactly 0 to the sum.
        pad = total - n
        out2d = jnp.pad(outputs.reshape(-1), (0, pad)).reshape(n_rows, _LANES)
        tgt2d = jnp.pad(targets.reshape(-1), (0, pad)).reshape(n_rows, _LANES)

    # Row tile: largest multiple of 8 that fits both n_rows and max_tile_rows.
    # At the default 4096 rows each input block is 2 MiB; double-buffered
    # footprint 2 x 2 x 2 MiB = 8 MiB, safe on every TPU generation's
    # scoped-VMEM default, so no vmem_limit_bytes override is needed.
    max_tile_rows = max(_SUBLANES, (max_tile_rows // _SUBLANES) * _SUBLANES)
    tile_rows = min(max_tile_rows, (n_rows // _SUBLANES) * _SUBLANES)
    grid = (pl.cdiv(n_rows, tile_rows),)
    mask_rows = (n_rows % tile_rows) != 0

    kernel = functools.partial(
        _circular_loss_kernel,
        inv_b=1.0 / B, n_rows=n_rows, tile_rows=tile_rows, mask_rows=mask_rows)

    loss = pl.pallas_call(
        kernel,
        out_shape=jax.ShapeDtypeStruct((1, 1), jnp.float32),
        grid_spec=pltpu.PrefetchScalarGridSpec(
            num_scalar_prefetch=0,
            grid=grid,
            in_specs=[
                pl.BlockSpec((tile_rows, _LANES), lambda i: (i, 0)),
                pl.BlockSpec((tile_rows, _LANES), lambda i: (i, 0)),
            ],
            out_specs=pl.BlockSpec((1, 1), lambda i: (0, 0)),
            scratch_shapes=[pltpu.VMEM((_SUBLANES, _LANES), jnp.float32)],
        ),
        compiler_params=pltpu.CompilerParams(
            dimension_semantics=("arbitrary",)),
    )(out2d, tgt2d)
    return loss[0, 0]


def circular_loss_ref(outputs, targets):
    # Pure-JAX reference mirroring the PyTorch module exactly.
    d_sin = outputs[:, 0].astype(jnp.float32) - targets[:, 0].astype(jnp.float32)
    d_cos = outputs[:, 1].astype(jnp.float32) - targets[:, 1].astype(jnp.float32)
    return jnp.mean(d_sin * d_sin) + jnp.mean(d_cos * d_cos)


if __name__ == "__main__":
    key = jax.random.PRNGKey(0)
    k1, k2, k3, k4, k5, k6 = jax.random.split(key, 6)

    # Case 1: tiny batch (B=8 -> 16 elems -> padded up to one (8,128) tile),
    # single grid step.
    B1 = 8
    out1 = jax.random.normal(k1, (B1, 2), dtype=jnp.float32)
    tgt1 = jax.random.normal(k2, (B1, 2), dtype=jnp.float32)
    l1 = circular_loss(out1, tgt1)
    jax.block_until_ready(l1)
    r1 = circular_loss_ref(out1, tgt1)
    assert jnp.allclose(l1, r1, rtol=1e-6, atol=1e-6), (l1, r1)

    # Case 2: 128-aligned batch -> copy-free reshape, 4 full row tiles
    # (exercises the multi-step grid accumulator path).
    B2 = 2048            # 4096 elems -> 32 rows -> 4 grid steps at tile_rows=8
    out2 = jax.random.normal(k3, (B2, 2), dtype=jnp.float32)
    tgt2 = jax.random.normal(k4, (B2, 2), dtype=jnp.float32)
    l2 = circular_loss(out2, tgt2, max_tile_rows=8)
    jax.block_until_ready(l2)
    r2 = circular_loss_ref(out2, tgt2)
    assert jnp.allclose(l2, r2, rtol=1e-5, atol=1e-5), (l2, r2)

    # Case 3: 128-aligned but ragged row count (37 rows, tile 16) -> partial
    # last grid block, exercises the in-kernel row masking; still copy-free.
    B3 = 2368            # 4736 elems -> exactly 37 rows of 128
    out3 = jax.random.normal(k5, (B3, 2), dtype=jnp.float32)
    tgt3 = jax.random.normal(k6, (B3, 2), dtype=jnp.float32)
    l3 = circular_loss(out3, tgt3, max_tile_rows=16)
    jax.block_until_ready(l3)
    r3 = circular_loss_ref(out3, tgt3)
    assert jnp.allclose(l3, r3, rtol=1e-5, atol=1e-5), (l3, r3)

    print("KERNEL_OK")
</pallas_src>

<mosaic_0001>
module attributes {stable_mosaic.version = 11 : i64} {
  func.func @_circular_loss_kernel(%arg0: i32, %arg1: memref<8x128xf32, #tpu.memory_space<vmem>>, %arg2: memref<8x128xf32, #tpu.memory_space<vmem>>, %arg3: memref<1x1xf32, #tpu.memory_space<vmem>>, %arg4: memref<8x128xf32, #tpu.memory_space<vmem>>) attributes {dimension_semantics = [#tpu.dimension_semantics<arbitrary>], iteration_bounds = array<i64: 1>, scalar_prefetch = 0 : i64, scratch_operands = 1 : i64, tpu.core_type = #tpu.core_type<tc>, window_params = [{transform_indices = @transform_0, window_bounds = array<i64: 8, 128>}, {transform_indices = @transform_1, window_bounds = array<i64: 8, 128>}, {pipeline_mode = #tpu.pipeline_mode<synchronous>, transform_indices = @transform_2, window_bounds = array<i64: 1, 1>}]} {
    %c0_i32 = arith.constant 0 : i32
    %0 = arith.cmpi eq, %arg0, %c0_i32 : i32
    %1 = arith.extui %0 : i1 to i32
    %c0_i32_0 = arith.constant 0 : i32
    %2 = arith.cmpi ne, %1, %c0_i32_0 : i32
    scf.if %2 {
      %cst_10 = arith.constant 0.000000e+00 : f32
      %15 = vector.broadcast %cst_10 : f32 to vector<8x128xf32>
      %c0_11 = arith.constant 0 : index
      %c0_12 = arith.constant 0 : index
      %16 = vector.load %arg4[%c0_11, %c0_12] : memref<8x128xf32, #tpu.memory_space<vmem>>, vector<8x128xf32>
      tpu.vector_store %arg4[%c0_11, %c0_12], %15 {strides = array<i32>} : memref<8x128xf32, #tpu.memory_space<vmem>>, vector<8x128xf32>,
    } else {
    }
    %c0 = arith.constant 0 : index
    %c0_1 = arith.constant 0 : index
    %3 = vector.load %arg1[%c0, %c0_1] : memref<8x128xf32, #tpu.memory_space<vmem>>, vector<8x128xf32>
    %c0_2 = arith.constant 0 : index
    %c0_3 = arith.constant 0 : index
    %4 = vector.load %arg2[%c0_2, %c0_3] : memref<8x128xf32, #tpu.memory_space<vmem>>, vector<8x128xf32>
    %5 = arith.subf %3, %4 : vector<8x128xf32>
    %6 = arith.mulf %5, %5 : vector<8x128xf32>
    %c0_4 = arith.constant 0 : index
    %c0_5 = arith.constant 0 : index
    %7 = vector.load %arg4[%c0_4, %c0_5] : memref<8x128xf32, #tpu.memory_space<vmem>>, vector<8x128xf32>
    %8 = vector.shape_cast %6 : vector<8x128xf32> to vector<1x8x128xf32>
    %cst = arith.constant dense<0.000000e+00> : vector<8x128xf32>
    %9 = vector.multi_reduction <add>, %8, %cst [0] : vector<1x8x128xf32> to vector<8x128xf32>
    %10 = arith.addf %7, %9 : vector<8x128xf32>
    %c0_6 = arith.constant 0 : index
    %c0_7 = arith.constant 0 : index
    %11 = vector.load %arg4[%c0_6, %c0_7] : memref<8x128xf32, #tpu.memory_space<vmem>>, vector<8x128xf32>
    tpu.vector_store %arg4[%c0_6, %c0_7], %10 {strides = array<i32>} : memref<8x128xf32, #tpu.memory_space<vmem>>, vector<8x128xf32>,
    %c0_i32_8 = arith.constant 0 : i32
    %12 = arith.cmpi eq, %arg0, %c0_i32_8 : i32
    %13 = arith.extui %12 : i1 to i32
    %c0_i32_9 = arith.constant 0 : i32
    %14 = arith.cmpi ne, %13, %c0_i32_9 : i32
    scf.if %14 {
      %c0_10 = arith.constant 0 : index
      %c0_11 = arith.constant 0 : index
      %15 = vector.load %arg4[%c0_10, %c0_11] : memref<8x128xf32, #tpu.memory_space<vmem>>, vector<8x128xf32>
      %16 = vector.shape_cast %15 : vector<8x128xf32> to vector<1x8x128xf32>
      %cst_12 = arith.constant dense<0.000000e+00> : vector<1xf32>
      %17 = vector.multi_reduction <add>, %16, %cst_12 [1, 2] : vector<1x8x128xf32> to vector<1xf32>
      %18 = vector.shape_cast %17 : vector<1xf32> to vector<1x1x1xf32>
      %19 = vector.extract %18[0, 0, 0] : f32 from vector<1x1x1xf32>
      %20 = vector.broadcast %19 : f32 to vector<1x1xf32>
      %cst_13 = arith.constant 1.250000e-01 : f32
      %21 = vector.broadcast %cst_13 : f32 to vector<1x1xf32>
      %22 = arith.mulf %20, %21 : vector<1x1xf32>
      %c0_14 = arith.constant 0 : index
      %c0_15 = arith.constant 0 : index
      %23 = vector.load %arg3[%c0_14, %c0_15] : memref<1x1xf32, #tpu.memory_space<vmem>>, vector<1x1xf32>
      tpu.vector_store %arg3[%c0_14, %c0_15], %22 {strides = array<i32>} : memref<1x1xf32, #tpu.memory_space<vmem>>, vector<1x1xf32>,
    } else {
    }
    return
  }
  func.func @transform_0(%arg0: i32) -> (i32, i32) {
    %c0_i32 = arith.constant 0 : i32
    %c0_i32_0 = arith.constant 0 : i32
    return %arg0, %c0_i32 : i32, i32
  }
  func.func @transform_1(%arg0: i32) -> (i32, i32) {
    %c0_i32 = arith.constant 0 : i32
    %c0_i32_0 = arith.constant 0 : i32
    return %arg0, %c0_i32 : i32, i32
  }
  func.func @transform_2(%arg0: i32) -> (i32, i32) {
    %c0_i32 = arith.constant 0 : i32
    %c0_i32_0 = arith.constant 0 : i32
    %c0_i32_1 = arith.constant 0 : i32
    return %c0_i32, %c0_i32_0 : i32, i32
  }
}

</mosaic_0001>

<bundles_post_ra>
// kernel: tpu_custom_call.1
= control target key start
LH: loop header
LB: loop body
LE: loop exit
PB: predicated region body
PF: predicated region fallthrough
CT: control target
= control target key end

     0   :  { %7 = vsyncpa [#allocation4], 0  ;;  %s198_s0 = inlined_call_operand.hbm [shape: f32[8,128], index: 0, kind: input, shape index: {}]   ;;  %s199_s1 = inlined_call_operand.hbm [shape: f32[8,128], index: 1, kind: input, shape index: {}]   ;;  %s200_s2 = inlined_call_operand.hbm [shape: f32[1,1], index: 2, kind: output, shape index: {}]  }
   0x1   :  { %8 = vsyncpa [#allocation7], 0 }
   0x2   :  { %9 = vsyncpa [#allocation5], 0  ;;  %s15_s11 = sshll.u32 %s198_s0, 4  ;;  %s171_s12 = smov [#allocation3]   ;;  %s16_s11 = int_to_ptr.hbm [resolvable:$true] %s15_s11 }
   0x3   :  { %s17_s13 = sshll.u32 %s171_s12, 4  ;;  %s26_s16 = sshll.u32 %s199_s1, 4  ;;  %s18_s13 = int_to_ptr.vmem [resolvable:$true] %s17_s13  ;;  %s27_s16 = int_to_ptr.hbm [resolvable:$true] %s26_s16 }
   0x4   :  { %20 = dma.hbm_to_vmem [thread:$0]  %s16_s11, 128, %s18_s13, [#allocation4]  }
   0x5   :  { %s172_s17 = smov [#allocation6]  }
   0x6   :  { %s28_s18 = sshll.u32 %s172_s17, 4  ;;  %s29_s18 = int_to_ptr.vmem [resolvable:$true] %s28_s18 }
   0x7   :  { %31 = dma.hbm_to_vmem [thread:$0]  %s27_s16, 128, %s29_s18, [#allocation7]  }
   0x8   :  { %165 = dma.done.wait [#allocation4], 128  }
   0x9   :  { %166 = vsyncadd [#allocation4], 4294967168 }
   0xa   :  { %167 = dma.done.wait [#allocation7], 128  }
   0xb   :  { %168 = vsyncadd [#allocation7], 4294967168  ;;  %v45_v0 = vld [vmem:[#allocation3] sm:$0xff]  ;;  %v46_v1 = vld [vmem:[#allocation6] sm:$0xff]  ;;  %s173_s0 = smov [#allocation8]   ;;  %s77_s21 = sshll.u32 %s200_s2, 4  ;;  %s78_s21 = int_to_ptr.hbm [resolvable:$true] %s77_s21 }
   0xc   :  { %v47_v2 = vsub.f32 %v45_v0, %v46_v1  ;;  %s75_s1 = sshll.u32 %s173_s0, 4  ;;  %vm68_vm0 = vcmask 0   ;;  %s76_s1 = int_to_ptr.vmem [resolvable:$true] %s75_s1 }
   0xe   :  { %v48_v3 = vmul.f32 %v47_v2, %v47_v2 }
  0x10   :  { %57 = vadd.xlane.f32.xlu0 %v48_v3 }
  0x83   :  { %v58_v4 = vpop.xlane.xlu0 %57 }
  0x84   :  { %v59_v5 = vrot.slane %v58_v4, 4 }
  0x86   :  { %v60_v6 = vadd.f32 %v59_v5, %v58_v4 }
  0x88   :  { %v61_v7 = vrot.slane %v60_v6, 2 }
  0x8a   :  { %v62_v8 = vadd.f32 %v61_v7, %v60_v6 }
  0x8c   :  { %v63_v9 = vrot.slane %v62_v8, 1 }
  0x8e   :  { %v64_v10 = vadd.f32 %v63_v9, %v62_v8 }
  0x90   :  { %88 = vpush %v64_v10 }
  0xc1   :  { %s89_s22 = spop %88 }
  0xc2   :  { %v66_v11 = vstv %s89_s22 }
  0xc3   :  { %v67_v12 = vmul.f32 0.125, %v66_v11 }
  0xc5   :  { %69 = vst.msk [vmem:[#allocation8] sm:$0x1] %vm68_vm0, %v67_v12 }
  0xc6   :  { %80 = dma.vmem_to_hbm [thread:$0]  %s76_s1, 16, %s78_s21, [#allocation5]  }
  0xc7   :  { %169 = dma.done.wait [#allocation5], 16  }
  0xc8   :  { %170 = vsyncadd [#allocation5], 4294967280 }
  0xc9   :  { %85 = vsyncpa [#allocation4], 1 }
  0xca   :  { %86 = vsyncpa [#allocation7], 1 }
  0xcb   :  { %87 = vsyncpa [#allocation5], 1 }

</bundles_post_ra>
